<compile_context>
chip_gen: v6e
topology: v6e:2x2x1
jax: 0.10.0
libtpu: 0.0.40
codegen_flags: <defaults>
</compile_context>

<pallas_src>
import math

import jax
import jax.numpy as jnp
from jax.experimental import pallas as pl
from jax.experimental.pallas import tpu as pltpu

_INV_SQRT2 = 1.0 / math.sqrt(2.0)

# Double-buffered working-set budget that is comfortable on every generation
# (v5e/v6e: 128 MiB physical; v7x: 64 MiB physical / 32 MiB default scoped).
_VMEM_WORKING_SET_BUDGET = 44 << 20


def _bert_intermediate_kernel(x_ref, w_ref, b_ref, o_ref):
    # x_ref: (tm, H) activation row tile (caller's compute dtype)
    # w_ref: (H, tn) weight column tile  (caller's compute dtype)
    # b_ref: (1, tn) bias tile           (f32)
    # o_ref: (tm, tn) output tile
    y = jnp.dot(x_ref[...], w_ref[...], preferred_element_type=jnp.float32)
    y = y + b_ref[...]                                   # bias add in f32
    act = y * 0.5 * (1.0 + jax.lax.erf(y * _INV_SQRT2))  # erf GELU in f32
    o_ref[...] = act.astype(o_ref.dtype)


def prepare_weight(torch_style_weight, dtype=None):
    """One-time param prep: PyTorch Linear weight (I, H) -> (H, I), optional cast."""
    w = jnp.asarray(torch_style_weight).T
    if dtype is not None:
        w = w.astype(dtype)
    return w


def _round_up(x, m):
    return ((x + m - 1) // m) * m


def _shrink(v, mult, floor):
    return max(floor, ((v // 2) // mult) * mult)


def bert_intermediate(hidden_states, weight_t, bias, *, tm=None, tn=None):
    """hidden_states: (..., H); weight_t: (H, I) pre-transposed; bias: (I,).

    Activations/weights are used in whatever dtype they arrive in (no hot-path
    cast); bias add + GELU are computed in f32; output dtype matches the input.
    """
    *lead, H = hidden_states.shape
    I = weight_t.shape[1]
    M = 1
    for d in lead:
        M *= d

    out_dtype = hidden_states.dtype
    x2d = hidden_states.reshape(M, H)
    w2d = weight_t

    x_item = jnp.dtype(x2d.dtype).itemsize
    w_item = jnp.dtype(w2d.dtype).itemsize
    o_item = jnp.dtype(out_dtype).itemsize

    if tm is None:
        tm = 512
    if tn is None:
        tn = 2048 if x_item <= 2 else 1024

    sublane = 8 if x_item == 4 else 16
    tm_eff = min(_round_up(tm, sublane), _round_up(M, sublane))
    tn_eff = min(_round_up(tn, 128), _round_up(I, 128))

    # Clamp tiles so the double-buffered working set fits every generation's VMEM.
    # TODO(synk): if this kernel is reused with H >~ 4K, add a K (H) grid axis
    # with an f32 VMEM accumulator instead of full-H tiles.
    def footprint(tm_, tn_):
        return 2 * (tm_ * H * x_item + H * tn_ * w_item
                    + tn_ * 4 + tm_ * tn_ * o_item)

    while footprint(tm_eff, tn_eff) > _VMEM_WORKING_SET_BUDGET and tn_eff > 256:
        tn_eff = _shrink(tn_eff, 128, 256)
    while footprint(tm_eff, tn_eff) > _VMEM_WORKING_SET_BUDGET and tm_eff > 2 * sublane:
        tm_eff = _shrink(tm_eff, sublane, sublane)

    # Pad only weight/bias columns (small); the activation is NOT padded --
    # the M axis uses cdiv with a partial last row block instead.
    Ip = _round_up(I, tn_eff)
    if Ip != I:
        w2d = jnp.pad(w2d, ((0, 0), (0, Ip - I)))
        bias = jnp.pad(bias, (0, Ip - I))
    b2d = bias.reshape(1, Ip).astype(jnp.float32)

    num_m = pl.cdiv(M, tm_eff)
    num_n = Ip // tn_eff

    x_bytes = M * H * x_item
    w_bytes = H * Ip * w_item
    o_bytes = M * Ip * o_item

    if M >= I:
        # Weight-resident: I-tiles outer, M-tiles inner.  Weight/bias tiles only
        # change on the outer axis; x rows stream (re-read num_n times).
        grid = (num_n, num_m)
        x_spec = pl.BlockSpec((tm_eff, H), lambda n, m: (m, 0))
        w_spec = pl.BlockSpec((H, tn_eff), lambda n, m: (0, n))
        b_spec = pl.BlockSpec((1, tn_eff), lambda n, m: (0, n))
        o_spec = pl.BlockSpec((tm_eff, tn_eff), lambda n, m: (m, n))
        bytes_accessed = x_bytes * num_n + w_bytes + b2d.size * 4 + o_bytes
    else:
        # Activation-resident: M-tiles outer, I-tiles inner.  The x row tile
        # stays put; the (smaller) weight streams (re-read num_m times).
        grid = (num_m, num_n)
        x_spec = pl.BlockSpec((tm_eff, H), lambda m, n: (m, 0))
        w_spec = pl.BlockSpec((H, tn_eff), lambda m, n: (0, n))
        b_spec = pl.BlockSpec((1, tn_eff), lambda m, n: (0, n))
        o_spec = pl.BlockSpec((tm_eff, tn_eff), lambda m, n: (m, n))
        bytes_accessed = x_bytes + w_bytes * num_m + b2d.size * 4 + o_bytes

    cost = pl.CostEstimate(
        flops=2 * M * H * Ip,
        transcendentals=M * Ip,
        bytes_accessed=int(bytes_accessed),
    )

    # Explicit scoped-VMEM limit: enough for the working set + DMA headroom,
    # never above v7x's 64 MiB physical VMEM.
    vmem_limit = int(min(max(footprint(tm_eff, tn_eff) + (8 << 20), 32 << 20),
                         60 << 20))

    out = pl.pallas_call(
        _bert_intermediate_kernel,
        out_shape=jax.ShapeDtypeStruct((M, Ip), out_dtype),
        grid_spec=pltpu.PrefetchScalarGridSpec(
            num_scalar_prefetch=0,
            grid=grid,
            in_specs=[x_spec, w_spec, b_spec],
            out_specs=o_spec,
        ),
        compiler_params=pltpu.CompilerParams(
            # Outer (resident-operand) axis parallel -> the two v7x TensorCores
            # split it and each keeps its own resident tile; inner axis arbitrary.
            dimension_semantics=("parallel", "arbitrary"),
            vmem_limit_bytes=vmem_limit,
        ),
        cost_estimate=cost,
    )(x2d, w2d, b2d)

    if Ip != I:
        out = out[:, :I]
    return out.reshape(*lead, I)


def _reference(hidden_states, weight, bias):
    y = jnp.einsum("bsh,ih->bsi", hidden_states, weight) + bias
    return y * 0.5 * (1.0 + jax.lax.erf(y * _INV_SQRT2))


if __name__ == "__main__":
    # Small config: hidden_size=32, intermediate_size=128, hidden_act='gelu'
    batch, seq, hidden, intermediate = 2, 8, 32, 128

    key = jax.random.PRNGKey(0)
    kx, kw, kb = jax.random.split(key, 3)
    x = jax.random.normal(kx, (batch, seq, hidden), dtype=jnp.float32)
    weight = jax.random.normal(kw, (intermediate, hidden), dtype=jnp.float32) * 0.02
    bias = jax.random.normal(kb, (intermediate,), dtype=jnp.float32) * 0.02

    ref = _reference(x, weight, bias)

    # f32 path (exact erf-GELU match to the PyTorch module).
    w_t = prepare_weight(weight)                       # one-time transpose
    out = jax.block_until_ready(bert_intermediate(x, w_t, bias))
    assert out.shape == (batch, seq, intermediate)
    assert jnp.allclose(out, ref, atol=1e-5, rtol=1e-5), "f32 mismatch vs reference"

    # bf16 end-to-end path: casts happen ONCE outside the hot path.
    x_bf16 = x.astype(jnp.bfloat16)
    w_t_bf16 = prepare_weight(weight, dtype=jnp.bfloat16)  # one-time transpose+cast
    out_bf16 = jax.block_until_ready(bert_intermediate(x_bf16, w_t_bf16, bias))
    assert out_bf16.shape == (batch, seq, intermediate)
    assert jnp.allclose(out_bf16.astype(jnp.float32), ref,
                        atol=2e-2, rtol=2e-2), "bf16 mismatch vs reference"

    print("KERNEL_OK")
</pallas_src>

<mosaic_0001>
module attributes {stable_mosaic.version = 11 : i64} {
  func.func @_bert_intermediate_kernel(%arg0: i32, %arg1: i32, %arg2: memref<16x32xf32, #tpu.memory_space<vmem>>, %arg3: memref<32x128xf32, #tpu.memory_space<vmem>>, %arg4: memref<1x128xf32, #tpu.memory_space<vmem>>, %arg5: memref<16x128xf32, #tpu.memory_space<vmem>>) attributes {dimension_semantics = [#tpu.dimension_semantics<parallel>, #tpu.dimension_semantics<arbitrary>], iteration_bounds = array<i64: 1, 1>, scalar_prefetch = 0 : i64, scratch_operands = 0 : i64, tpu.core_type = #tpu.core_type<tc>, window_params = [{transform_indices = @transform_0, window_bounds = array<i64: 16, 32>}, {transform_indices = @transform_1, window_bounds = array<i64: 32, 128>}, {transform_indices = @transform_2, window_bounds = array<i64: 1, 128>}, {transform_indices = @transform_3, window_bounds = array<i64: 16, 128>}]} {
    %c0 = arith.constant 0 : index
    %c0_0 = arith.constant 0 : index
    %0 = vector.load %arg2[%c0, %c0_0] : memref<16x32xf32, #tpu.memory_space<vmem>>, vector<16x32xf32>
    %c0_1 = arith.constant 0 : index
    %c0_2 = arith.constant 0 : index
    %1 = vector.load %arg3[%c0_1, %c0_2] : memref<32x128xf32, #tpu.memory_space<vmem>>, vector<32x128xf32>
    %cst = arith.constant dense<0.000000e+00> : vector<16x128xf32>
    %2 = tpu.matmul %0, %1, %cst {dimension_numbers = #tpu.dot_dimension_numbers<[1], [0], [0], [1], [0, 0, 1, 1], [], []>} : vector<16x32xf32>, vector<32x128xf32>, vector<16x128xf32> -> vector<16x128xf32>
    %c0_3 = arith.constant 0 : index
    %c0_4 = arith.constant 0 : index
    %3 = vector.load %arg4[%c0_3, %c0_4] : memref<1x128xf32, #tpu.memory_space<vmem>>, vector<1x128xf32>
    %4 = vector.broadcast %3 : vector<1x128xf32> to vector<16x128xf32>
    %5 = arith.addf %2, %4 : vector<16x128xf32>
    %cst_5 = arith.constant 5.000000e-01 : f32
    %6 = vector.broadcast %cst_5 : f32 to vector<16x128xf32>
    %7 = arith.mulf %5, %6 : vector<16x128xf32>
    %cst_6 = arith.constant 0.707106769 : f32
    %8 = vector.broadcast %cst_6 : f32 to vector<16x128xf32>
    %9 = arith.mulf %5, %8 : vector<16x128xf32>
    %10 = math.erf %9 : vector<16x128xf32>
    %cst_7 = arith.constant 1.000000e+00 : f32
    %11 = vector.broadcast %cst_7 : f32 to vector<16x128xf32>
    %12 = arith.addf %11, %10 : vector<16x128xf32>
    %13 = arith.mulf %7, %12 : vector<16x128xf32>
    %c0_8 = arith.constant 0 : index
    %c0_9 = arith.constant 0 : index
    %14 = vector.load %arg5[%c0_8, %c0_9] : memref<16x128xf32, #tpu.memory_space<vmem>>, vector<16x128xf32>
    tpu.vector_store %arg5[%c0_8, %c0_9], %13 {strides = array<i32>} : memref<16x128xf32, #tpu.memory_space<vmem>>, vector<16x128xf32>,
    return
  }
  func.func @transform_0(%arg0: i32, %arg1: i32) -> (i32, i32) {
    %c0_i32 = arith.constant 0 : i32
    %c0_i32_0 = arith.constant 0 : i32
    return %arg0, %c0_i32 : i32, i32
  }
  func.func @transform_1(%arg0: i32, %arg1: i32) -> (i32, i32) {
    %c0_i32 = arith.constant 0 : i32
    %c0_i32_0 = arith.constant 0 : i32
    return %c0_i32, %arg1 : i32, i32
  }
  func.func @transform_2(%arg0: i32, %arg1: i32) -> (i32, i32) {
    %c0_i32 = arith.constant 0 : i32
    %c0_i32_0 = arith.constant 0 : i32
    return %c0_i32, %arg1 : i32, i32
  }
  func.func @transform_3(%arg0: i32, %arg1: i32) -> (i32, i32) {
    %c0_i32 = arith.constant 0 : i32
    return %arg0, %arg1 : i32, i32
  }
}

</mosaic_0001>

<bundles_post_ra>
// kernel: tpu_custom_call.1
= control target key start
LH: loop header
LB: loop body
LE: loop exit
PB: predicated region body
PF: predicated region fallthrough
CT: control target
= control target key end

     0   :  { %8 = vsyncpa [#allocation3], 0  ;;  %s311_s0 = inlined_call_operand.hbm [shape: f32[16,32], index: 0, kind: input, shape index: {}]   ;;  %s312_s1 = inlined_call_operand.hbm [shape: f32[32,128], index: 1, kind: input, shape index: {}]   ;;  %s313_s2 = inlined_call_operand.vmem [shape: f32[1,128], index: 2, kind: input, shape index: {}]   ;;  %s314_s3 = inlined_call_operand.hbm [shape: f32[16,128], index: 3, kind: output, shape index: {}]  }
   0x1   :  { %9 = vsyncpa [#allocation6], 0 }
   0x2   :  { %10 = vsyncpa [#allocation4], 0  ;;  %s263_s12 = smov [#allocation2]  }
   0x3   :  { %s16_s13 = sshll.u32 %s263_s12, 4  ;;  %s17_s13 = int_to_ptr.vmem [resolvable:$true] %s16_s13 }
   0x4   :  { %s205_s14 = scalar_lea.vmem %s17_s13, 256  ;;  %p210_p1 = scmp.lt.s32.totalorder %s17_s13, %s17_s13 }
   0x5   :  { %p206_p0 = scmp.ne.s32.totalorder %s17_s13, %s205_s14  ;;  %p211_p2 = scmp.lt.s32.totalorder %s205_s14, %s205_s14 }
   0x7   :  { %p212_p3 = por %p211_p2, %p210_p1 }
   0x9   :  { %p213_p4 = pnand %p212_p3, %p206_p0 }
   0xb   :  { %216 = shalt.err (!%p213_p4)
}
   0xc   :  { %s264_s15 = smov 128   ;;  %s265_s16 = smov 8  }
   0xd   :  { %22 = dma.hbm_to_vmem [thread:$0]  %s311_s0, 256, %s17_s13, [#allocation3], %s264_s15, %s264_s15, %s265_s16  }
   0xe   :  { %s266_s19 = smov [#allocation5]  }
   0xf   :  { %s28_s20 = sshll.u32 %s266_s19, 4  ;;  %s29_s20 = int_to_ptr.vmem [resolvable:$true] %s28_s20 }
  0x10   :  { %s225_s21 = scalar_lea.vmem %s29_s20, 512  ;;  %p230_p6 = scmp.lt.s32.totalorder %s29_s20, %s29_s20 }
  0x11   :  { %p226_p5 = scmp.ne.s32.totalorder %s29_s20, %s225_s21  ;;  %p231_p7 = scmp.lt.s32.totalorder %s225_s21, %s225_s21 }
  0x13   :  { %p232_p8 = por %p231_p7, %p230_p6 }
  0x15   :  { %p233_p9 = pnand %p232_p8, %p226_p5 }
  0x17   :  { %236 = shalt.err (!%p233_p9)
}
  0x18   :  { %34 = dma.hbm_to_vmem [thread:$0]  %s312_s1, 512, %s29_s20, [#allocation6], %s264_s15, %s264_s15, %s265_s16  }
  0x19   :  { %257 = dma.done.wait [#allocation3], 256  }
  0x1a   :  { %258 = vsyncadd [#allocation3], 4294967040 }
  0x1b   :  { %259 = dma.done.wait [#allocation6], 512  }
  0x1c   :  { %260 = vsyncadd [#allocation6], 4294966784  ;;  %vm56_vm0 = vcmask 261120   ;;  %v48_v0 = vld [vmem:[#allocation5 + $0x18] sm:$0xff]  ;;  %v47_v1 = vld [vmem:[#allocation5 + $0x10] sm:$0xff]  ;;  %s267_s24 = smov [#allocation7]  }
  0x1d   :  { %177 = vmatprep.subr.mxu0 %v48_v0  ;;  %v43_v2 = vld [vmem:[#allocation2] sm:$0xff]  ;;  %v46_v3 = vld [vmem:[#allocation5 + $0x8] sm:$0xff]  ;;  %v45_v4 = vld [vmem:[#allocation5] sm:$0xff]  ;;  %s155_s25 = sshll.u32 %s267_s24, 4  ;;  %s156_s25 = int_to_ptr.vmem [resolvable:$true] %s155_s25 }
  0x1e   :  { %178 = vmatpush3.msra.mxu0 %v48_v0  ;;  %185 = vmatprep.mubr.msk.f32.mxu0 %vm56_vm0, %v43_v2  ;;  %v44_v5 = vld [vmem:[#allocation2 + $0x8] sm:$0xff]  ;;  %v168_v6 = vld [vmem:[%s313_s2] ss:$0 sm:$0xff]  ;;  %s237_s2 = scalar_lea.vmem %s156_s25, 256  ;;  %p242_p11 = scmp.lt.s32.totalorder %s156_s25, %s156_s25 }
  0x1f   :  { %179 = vmatprep.subr.mxu0 %v47_v1  ;;  %p238_p10 = scmp.ne.s32.totalorder %s156_s25, %s237_s2  ;;  %p243_p12 = scmp.lt.s32.totalorder %s237_s2, %s237_s2 }
  0x20   :  { %180 = vmatpush3.msra.mxu0 %v47_v1 }
  0x21   :  { %181 = vmatprep.subr.mxu0 %v46_v3  ;;  %p244_p13 = por %p243_p12, %p242_p11 }
  0x22   :  { %182 = vmatpush3.msra.mxu0 %v46_v3 }
  0x23   :  { %183 = vmatprep.subr.mxu0 %v45_v4  ;;  %p245_p0 = pnand %p244_p13, %p238_p10 }
  0x24   :  { %184 = vmatpush3.msra.mxu0 %v45_v4 }
  0x25   :  { %186 = vmatmul.mubr.msk.f32.vlgmr.msra.gmra.mxu0 %vm56_vm0, %v44_v5 }
  0xe5   :  { %v187_v7 = vpop.f32.mrf.mxu0 }
  0xe6   :  { %v135_v8 = vadd.f32 %v187_v7, %v168_v6 }
  0xe7   :  { %v129_v9 = vpop.f32.mrf.mxu0 }
  0xe8   :  { %v141_v10 = vmul.f32 0.70710677, %v135_v8  ;;  %v130_v11 = vadd.f32 %v168_v6, %v129_v9  ;;  %v139_v14 = vmul.f32 0.5, %v135_v8 }
  0xea   :  { %193 = verf.f32 %v141_v10  ;;  %v140_v12 = vmul.f32 0.70710677, %v130_v11  ;;  %v138_v18 = vmul.f32 0.5, %v130_v11 }
  0xec   :  { %195 = verf.f32 %v140_v12 }
  0xf7   :  { %v194_v13 = vpop.eup %193 }
  0xf8   :  { %v145_v15 = vadd.f32 1.0, %v194_v13 }
  0xf9   :  { %v196_v16 = vpop.eup %195 }
  0xfa   :  { %v147_v17 = vmul.f32 %v145_v15, %v139_v14  ;;  %v144_v19 = vadd.f32 1.0, %v196_v16 }
  0xfc   :  { %149 = vst [vmem:[#allocation7 + $0x8] sm:$0xff] %v147_v17  ;;  %v146_v20 = vmul.f32 %v144_v19, %v138_v18 }
  0xfe   :  { %148 = vst [vmem:[#allocation7] sm:$0xff] %v146_v20 }
  0xff   :  { %248 = shalt.err (!%p245_p0)
}
 0x100   :  { %161 = dma.vmem_to_hbm [thread:$0]  %s156_s25, 256, %s314_s3, [#allocation4], %s264_s15, %s264_s15, %s265_s16  }
 0x101   :  { %261 = dma.done.wait [#allocation4], 256  }
 0x102   :  { %262 = vsyncadd [#allocation4], 4294967040 }
 0x103   :  { %165 = vsyncpa [#allocation3], 1 }
 0x104   :  { %166 = vsyncpa [#allocation6], 1 }
 0x105   :  { %167 = vsyncpa [#allocation4], 1 }

</bundles_post_ra>
